<compile_context>
chip_gen: v7x
topology: tpu7x:2x2x1
jax: 0.10.0
libtpu: 0.0.40
codegen_flags: <defaults>
</compile_context>

<pallas_src>
import functools

import jax
import jax.numpy as jnp
from jax.experimental import pallas as pl
from jax.experimental.pallas import tpu as pltpu


def _round_up(x, m):
    return (x + m - 1) // m * m


def ffn_kernel(x_ref, w1_ref, b1_ref, w2_ref, b2_ref, gamma_ref, beta_ref,
               o_ref, *, d_in, eps):
    # x_ref: (TM, d_in_p) tile of flattened positions, in the matmul dtype.
    x = x_ref[...]

    # Conv1d(d_in, d_hid, 1) == x @ W1^T + b1.  Contract the feature dims of
    # both operands directly (W1 stays in PyTorch (d_hid, d_in) layout).
    h = jax.lax.dot_general(x, w1_ref[...],
                            (((1,), (1,)), ((), ())),
                            preferred_element_type=jnp.float32)
    h = jnp.maximum(h + b1_ref[...], 0.0)          # bias + ReLU in f32
    h = h.astype(x.dtype)                          # low-precision MXU operand

    # Conv1d(d_hid, d_in, 1) == h @ W2^T + b2.
    y = jax.lax.dot_general(h, w2_ref[...],
                            (((1,), (1,)), ((), ())),
                            preferred_element_type=jnp.float32)
    y = y + b2_ref[...]

    # Residual add + LayerNorm over the *real* d_in features (f32 math).
    # Padded feature lanes of x, y are exactly zero, so sums over the padded
    # axis equal sums over the real features; divide by d_in explicitly.
    z = y + x.astype(jnp.float32)
    mean = jnp.sum(z, axis=-1, keepdims=True) * (1.0 / d_in)
    lane = jax.lax.broadcasted_iota(jnp.int32, (1, z.shape[-1]), 1)
    mask = lane < d_in
    zc = jnp.where(mask, z - mean, 0.0)
    var = jnp.sum(zc * zc, axis=-1, keepdims=True) * (1.0 / d_in)
    zn = zc * jax.lax.rsqrt(var + eps)
    o_ref[...] = (zn * gamma_ref[...] + beta_ref[...]).astype(o_ref.dtype)


def positionwise_ffn(x, w1, b1, w2, b2, gamma, beta, *, tile_rows=512,
                     eps=1e-5):
    """x: (B, L, d_in). w1: (d_hid, d_in), w2: (d_in, d_hid) (PyTorch Conv1d
    layout with the kernel dim squeezed). Returns (B, L, d_in)."""
    B, L, d_in = x.shape
    d_hid = w1.shape[0]
    N = B * L

    # Lane-dense feature padding (multiples of 128).
    d_in_p = _round_up(d_in, 128)
    d_hid_p = _round_up(d_hid, 128)

    # Row tile: big for MXU/pipeline efficiency, clamped to the problem size.
    # (v5e: multiples of 128 suffice; v6e/v7x: multiples of 256 fill the MXU.
    #  On v7x keep N_pad/tm >= 2 so both TensorCores get grid steps.)
    tm = max(8, _round_up(min(tile_rows, _round_up(N, 8)), 8))
    N_pad = _round_up(N, tm)
    grid = (N_pad // tm,)

    cdtype = x.dtype  # matmul operand dtype (bf16 inputs stay bf16 on the MXU)

    x2 = jnp.pad(x.reshape(N, d_in),
                 ((0, N_pad - N), (0, d_in_p - d_in))).astype(cdtype)
    w1_p = jnp.pad(w1, ((0, d_hid_p - d_hid), (0, d_in_p - d_in))).astype(cdtype)
    w2_p = jnp.pad(w2, ((0, d_in_p - d_in), (0, d_hid_p - d_hid))).astype(cdtype)
    b1_p = jnp.pad(b1, (0, d_hid_p - d_hid)).astype(jnp.float32).reshape(1, d_hid_p)
    b2_p = jnp.pad(b2, (0, d_in_p - d_in)).astype(jnp.float32).reshape(1, d_in_p)
    g_p = jnp.pad(gamma, (0, d_in_p - d_in)).astype(jnp.float32).reshape(1, d_in_p)
    be_p = jnp.pad(beta, (0, d_in_p - d_in)).astype(jnp.float32).reshape(1, d_in_p)

    # VMEM budget: double-buffered x/out tiles + weights + f32 temporaries.
    itm = jnp.dtype(cdtype).itemsize
    vmem_needed = (2 * tm * d_in_p * itm            # x tiles (2 bufs)
                   + 2 * tm * d_in_p * itm          # out tiles (2 bufs)
                   + 2 * 2 * d_hid_p * d_in_p * itm  # both weights, 2 bufs each
                   + tm * d_hid_p * 4                # h temporary (f32)
                   + 2 * tm * d_in_p * 4)            # y / z temporaries (f32)
    vmem_limit = int(min(60 * 2**20, max(2 * vmem_needed, 32 * 2**20)))

    cost = pl.CostEstimate(
        flops=2 * N_pad * d_in_p * d_hid_p * 2,
        transcendentals=N_pad,  # one rsqrt per row
        bytes_accessed=(x2.size * itm + N_pad * d_in_p * itm
                        + (w1_p.size + w2_p.size) * itm))

    kernel = functools.partial(ffn_kernel, d_in=d_in, eps=eps)

    out = pl.pallas_call(
        kernel,
        out_shape=jax.ShapeDtypeStruct((N_pad, d_in_p), x.dtype),
        grid_spec=pltpu.PrefetchScalarGridSpec(
            num_scalar_prefetch=0,
            grid=grid,
            in_specs=[
                pl.BlockSpec((tm, d_in_p), lambda i: (i, 0)),        # x tile
                pl.BlockSpec((d_hid_p, d_in_p), lambda i: (0, 0)),   # W1
                pl.BlockSpec((1, d_hid_p), lambda i: (0, 0)),        # b1
                pl.BlockSpec((d_in_p, d_hid_p), lambda i: (0, 0)),   # W2
                pl.BlockSpec((1, d_in_p), lambda i: (0, 0)),         # b2
                pl.BlockSpec((1, d_in_p), lambda i: (0, 0)),         # gamma
                pl.BlockSpec((1, d_in_p), lambda i: (0, 0)),         # beta
            ],
            out_specs=pl.BlockSpec((tm, d_in_p), lambda i: (i, 0)),
        ),
        compiler_params=pltpu.CompilerParams(
            dimension_semantics=("parallel",),
            vmem_limit_bytes=vmem_limit),
        cost_estimate=cost,
    )(x2, w1_p, b1_p, w2_p, b2_p, g_p, be_p)

    return out[:N, :d_in].reshape(B, L, d_in)


if __name__ == "__main__":
    # Small shapes consistent with the module: (B, L, d_in), hidden d_hid.
    B, L, d_in, d_hid = 2, 8, 32, 64

    key = jax.random.PRNGKey(0)
    kx, k1, kb1, k2, kb2 = jax.random.split(key, 5)

    x = jax.random.normal(kx, (B, L, d_in), dtype=jnp.float32)

    # Conv1d(d_in, d_hid, 1) weights: (d_hid, d_in) after squeezing kernel dim.
    w1 = jax.random.normal(k1, (d_hid, d_in), dtype=jnp.float32) * 0.1
    b1 = jax.random.normal(kb1, (d_hid,), dtype=jnp.float32) * 0.1
    # Conv1d(d_hid, d_in, 1) weights: (d_in, d_hid).
    w2 = jax.random.normal(k2, (d_in, d_hid), dtype=jnp.float32) * 0.1
    b2 = jax.random.normal(kb2, (d_in,), dtype=jnp.float32) * 0.1
    # LayerNorm default init.
    gamma = jnp.ones((d_in,), dtype=jnp.float32)
    beta = jnp.zeros((d_in,), dtype=jnp.float32)

    out = positionwise_ffn(x, w1, b1, w2, b2, gamma, beta)
    jax.block_until_ready(out)

    # Pure-JAX reference check (f32).
    h = jnp.maximum(jnp.einsum("bld,hd->blh", x, w1) + b1, 0.0)
    y = jnp.einsum("blh,dh->bld", h, w2) + b2
    z = y + x
    mean = jnp.mean(z, axis=-1, keepdims=True)
    var = jnp.mean((z - mean) ** 2, axis=-1, keepdims=True)
    ref = (z - mean) / jnp.sqrt(var + 1e-5) * gamma + beta
    assert jnp.allclose(out, ref, atol=1e-4, rtol=1e-4), "mismatch vs reference"

    # bf16 smoke test (exercises the low-precision MXU operand path).
    out_bf16 = positionwise_ffn(x.astype(jnp.bfloat16), w1, b1, w2, b2,
                                gamma, beta)
    jax.block_until_ready(out_bf16)
    assert bool(jnp.all(jnp.isfinite(out_bf16.astype(jnp.float32))))

    print("KERNEL_OK")
</pallas_src>

<mosaic_0001>
module attributes {stable_mosaic.version = 11 : i64} {
  func.func @ffn_kernel(%arg0: i32, %arg1: memref<16x128xf32, #tpu.memory_space<vmem>>, %arg2: memref<128x128xf32, #tpu.memory_space<vmem>>, %arg3: memref<1x128xf32, #tpu.memory_space<vmem>>, %arg4: memref<128x128xf32, #tpu.memory_space<vmem>>, %arg5: memref<1x128xf32, #tpu.memory_space<vmem>>, %arg6: memref<1x128xf32, #tpu.memory_space<vmem>>, %arg7: memref<1x128xf32, #tpu.memory_space<vmem>>, %arg8: memref<16x128xf32, #tpu.memory_space<vmem>>) attributes {dimension_semantics = [#tpu.dimension_semantics<parallel>], iteration_bounds = array<i64: 1>, scalar_prefetch = 0 : i64, scratch_operands = 0 : i64, tpu.core_type = #tpu.core_type<tc>, window_params = [{transform_indices = @transform_0, window_bounds = array<i64: 16, 128>}, {pipeline_mode = #tpu.pipeline_mode<synchronous>, transform_indices = @transform_1, window_bounds = array<i64: 128, 128>}, {pipeline_mode = #tpu.pipeline_mode<synchronous>, transform_indices = @transform_2, window_bounds = array<i64: 1, 128>}, {pipeline_mode = #tpu.pipeline_mode<synchronous>, transform_indices = @transform_3, window_bounds = array<i64: 128, 128>}, {pipeline_mode = #tpu.pipeline_mode<synchronous>, transform_indices = @transform_4, window_bounds = array<i64: 1, 128>}, {pipeline_mode = #tpu.pipeline_mode<synchronous>, transform_indices = @transform_5, window_bounds = array<i64: 1, 128>}, {pipeline_mode = #tpu.pipeline_mode<synchronous>, transform_indices = @transform_6, window_bounds = array<i64: 1, 128>}, {transform_indices = @transform_7, window_bounds = array<i64: 16, 128>}]} {
    %c0 = arith.constant 0 : index
    %c0_0 = arith.constant 0 : index
    %0 = vector.load %arg1[%c0, %c0_0] : memref<16x128xf32, #tpu.memory_space<vmem>>, vector<16x128xf32>
    %c0_1 = arith.constant 0 : index
    %c0_2 = arith.constant 0 : index
    %1 = vector.load %arg2[%c0_1, %c0_2] : memref<128x128xf32, #tpu.memory_space<vmem>>, vector<128x128xf32>
    %cst = arith.constant dense<0.000000e+00> : vector<16x128xf32>
    %2 = tpu.matmul %0, %1, %cst {dimension_numbers = #tpu.dot_dimension_numbers<[1], [1], [0], [0], [0, 0, 1, 0], [], []>} : vector<16x128xf32>, vector<128x128xf32>, vector<16x128xf32> -> vector<16x128xf32>
    %c0_3 = arith.constant 0 : index
    %c0_4 = arith.constant 0 : index
    %3 = vector.load %arg3[%c0_3, %c0_4] : memref<1x128xf32, #tpu.memory_space<vmem>>, vector<1x128xf32>
    %4 = vector.broadcast %3 : vector<1x128xf32> to vector<16x128xf32>
    %5 = arith.addf %2, %4 : vector<16x128xf32>
    %cst_5 = arith.constant 0.000000e+00 : f32
    %6 = vector.broadcast %cst_5 : f32 to vector<16x128xf32>
    %7 = arith.maximumf %5, %6 : vector<16x128xf32>
    %c0_6 = arith.constant 0 : index
    %c0_7 = arith.constant 0 : index
    %8 = vector.load %arg4[%c0_6, %c0_7] : memref<128x128xf32, #tpu.memory_space<vmem>>, vector<128x128xf32>
    %cst_8 = arith.constant dense<0.000000e+00> : vector<16x128xf32>
    %9 = tpu.matmul %7, %8, %cst_8 {dimension_numbers = #tpu.dot_dimension_numbers<[1], [1], [0], [0], [0, 0, 1, 0], [], []>} : vector<16x128xf32>, vector<128x128xf32>, vector<16x128xf32> -> vector<16x128xf32>
    %c0_9 = arith.constant 0 : index
    %c0_10 = arith.constant 0 : index
    %10 = vector.load %arg5[%c0_9, %c0_10] : memref<1x128xf32, #tpu.memory_space<vmem>>, vector<1x128xf32>
    %11 = vector.broadcast %10 : vector<1x128xf32> to vector<16x128xf32>
    %12 = arith.addf %9, %11 : vector<16x128xf32>
    %13 = arith.addf %12, %0 : vector<16x128xf32>
    %cst_11 = arith.constant dense<0.000000e+00> : vector<16xf32>
    %14 = vector.multi_reduction <add>, %13, %cst_11 [1] : vector<16x128xf32> to vector<16xf32>
    %15 = vector.shape_cast %14 : vector<16xf32> to vector<16x1xf32>
    %cst_12 = arith.constant 3.125000e-02 : f32
    %16 = vector.broadcast %cst_12 : f32 to vector<16x1xf32>
    %17 = arith.mulf %15, %16 : vector<16x1xf32>
    %18 = tpu.iota {dimensions = array<i32: 1>} : vector<1x128xi32>
    %c32_i32 = arith.constant 32 : i32
    %19 = vector.broadcast %c32_i32 : i32 to vector<1x128xi32>
    %20 = arith.cmpi slt, %18, %19 : vector<1x128xi32>
    %21 = vector.broadcast %17 : vector<16x1xf32> to vector<16x128xf32>
    %22 = arith.subf %13, %21 : vector<16x128xf32>
    %cst_13 = arith.constant 0.000000e+00 : f32
    %23 = vector.shape_cast %20 : vector<1x128xi1> to vector<1x128xi1>
    %24 = vector.broadcast %23 : vector<1x128xi1> to vector<16x128xi1>
    %25 = vector.broadcast %cst_13 : f32 to vector<16x128xf32>
    %26 = arith.select %24, %22, %25 : vector<16x128xi1>, vector<16x128xf32>
    %27 = arith.mulf %26, %26 : vector<16x128xf32>
    %cst_14 = arith.constant dense<0.000000e+00> : vector<16xf32>
    %28 = vector.multi_reduction <add>, %27, %cst_14 [1] : vector<16x128xf32> to vector<16xf32>
    %29 = vector.shape_cast %28 : vector<16xf32> to vector<16x1xf32>
    %cst_15 = arith.constant 3.125000e-02 : f32
    %30 = vector.broadcast %cst_15 : f32 to vector<16x1xf32>
    %31 = arith.mulf %29, %30 : vector<16x1xf32>
    %cst_16 = arith.constant 9.99999974E-6 : f32
    %32 = vector.broadcast %cst_16 : f32 to vector<16x1xf32>
    %33 = arith.addf %31, %32 : vector<16x1xf32>
    %34 = math.rsqrt %33 : vector<16x1xf32>
    %35 = vector.broadcast %34 : vector<16x1xf32> to vector<16x128xf32>
    %36 = arith.mulf %26, %35 : vector<16x128xf32>
    %c0_17 = arith.constant 0 : index
    %c0_18 = arith.constant 0 : index
    %37 = vector.load %arg6[%c0_17, %c0_18] : memref<1x128xf32, #tpu.memory_space<vmem>>, vector<1x128xf32>
    %38 = vector.broadcast %37 : vector<1x128xf32> to vector<16x128xf32>
    %39 = arith.mulf %36, %38 : vector<16x128xf32>
    %c0_19 = arith.constant 0 : index
    %c0_20 = arith.constant 0 : index
    %40 = vector.load %arg7[%c0_19, %c0_20] : memref<1x128xf32, #tpu.memory_space<vmem>>, vector<1x128xf32>
    %41 = vector.broadcast %40 : vector<1x128xf32> to vector<16x128xf32>
    %42 = arith.addf %39, %41 : vector<16x128xf32>
    %c0_21 = arith.constant 0 : index
    %c0_22 = arith.constant 0 : index
    %43 = vector.load %arg8[%c0_21, %c0_22] : memref<16x128xf32, #tpu.memory_space<vmem>>, vector<16x128xf32>
    tpu.vector_store %arg8[%c0_21, %c0_22], %42 {strides = array<i32>} : memref<16x128xf32, #tpu.memory_space<vmem>>, vector<16x128xf32>,
    return
  }
  func.func @transform_0(%arg0: i32) -> (i32, i32) {
    %c0_i32 = arith.constant 0 : i32
    %c0_i32_0 = arith.constant 0 : i32
    return %arg0, %c0_i32 : i32, i32
  }
  func.func @transform_1(%arg0: i32) -> (i32, i32) {
    %c0_i32 = arith.constant 0 : i32
    %c0_i32_0 = arith.constant 0 : i32
    %c0_i32_1 = arith.constant 0 : i32
    return %c0_i32, %c0_i32_0 : i32, i32
  }
  func.func @transform_2(%arg0: i32) -> (i32, i32) {
    %c0_i32 = arith.constant 0 : i32
    %c0_i32_0 = arith.constant 0 : i32
    %c0_i32_1 = arith.constant 0 : i32
    return %c0_i32, %c0_i32_0 : i32, i32
  }
  func.func @transform_3(%arg0: i32) -> (i32, i32) {
    %c0_i32 = arith.constant 0 : i32
    %c0_i32_0 = arith.constant 0 : i32
    %c0_i32_1 = arith.constant 0 : i32
    return %c0_i32, %c0_i32_0 : i32, i32
  }
  func.func @transform_4(%arg0: i32) -> (i32, i32) {
    %c0_i32 = arith.constant 0 : i32
    %c0_i32_0 = arith.constant 0 : i32
    %c0_i32_1 = arith.constant 0 : i32
    return %c0_i32, %c0_i32_0 : i32, i32
  }
  func.func @transform_5(%arg0: i32) -> (i32, i32) {
    %c0_i32 = arith.constant 0 : i32
    %c0_i32_0 = arith.constant 0 : i32
    %c0_i32_1 = arith.constant 0 : i32
    return %c0_i32, %c0_i32_0 : i32, i32
  }
  func.func @transform_6(%arg0: i32) -> (i32, i32) {
    %c0_i32 = arith.constant 0 : i32
    %c0_i32_0 = arith.constant 0 : i32
    %c0_i32_1 = arith.constant 0 : i32
    return %c0_i32, %c0_i32_0 : i32, i32
  }
  func.func @transform_7(%arg0: i32) -> (i32, i32) {
    %c0_i32 = arith.constant 0 : i32
    %c0_i32_0 = arith.constant 0 : i32
    return %arg0, %c0_i32 : i32, i32
  }
}

</mosaic_0001>

<bundles_post_ra>
// kernel: tpu_custom_call.1
= control target key start
LH: loop header
LB: loop body
LE: loop exit
PB: predicated region body
PF: predicated region fallthrough
CT: control target
= control target key end

     0   :  { %12 = vsyncpa [#allocation3], 0  ;;  %s744_s0 = inlined_call_operand.hbm [shape: f32[16,128], index: 0, kind: input, shape index: {}]   ;;  %s745_s1 = inlined_call_operand.hbm [shape: f32[128,128], index: 1, kind: input, shape index: {}]   ;;  %s746_s2 = inlined_call_operand.vmem [shape: f32[1,128], index: 2, kind: input, shape index: {}]   ;;  %s747_s3 = inlined_call_operand.hbm [shape: f32[128,128], index: 3, kind: input, shape index: {}]   ;;  %s748_s4 = inlined_call_operand.vmem [shape: f32[1,128], index: 4, kind: input, shape index: {}]   ;;  %s749_s5 = inlined_call_operand.vmem [shape: f32[1,128], index: 5, kind: input, shape index: {}]   ;;  %s750_s6 = inlined_call_operand.vmem [shape: f32[1,128], index: 6, kind: input, shape index: {}]   ;;  %s751_s7 = inlined_call_operand.hbm [shape: f32[16,128], index: 7, kind: output, shape index: {}]  }
   0x1   :  { %13 = vsyncpa [#allocation6], 0 }
   0x2   :  { %14 = vsyncpa [#allocation4], 0  ;;  %s615_s24 = smov [#allocation5]   ;;  %s616_s26 = smov [#allocation2]  }
   0x3   :  { %s32_s25 = sshll.u32 %s615_s24, 4  ;;  %s20_s27 = sshll.u32 %s616_s26, 4  ;;  %s33_s25 = int_to_ptr.vmem [resolvable:$true] %s32_s25  ;;  %s661_s27 = int_to_ptr.vmem [resolvable:$true] %s20_s27 }
   0x4   :  { %s521_s30 = scalar_lea.hbm %s745_s1, 2048 }
   0x5   :  { %p522_p0 = scmp.ne.s32.totalorder %s745_s1, %s521_s30  ;;  %p525_p1 = scmp.lt.u32.totalorder %s521_s30, %s745_s1 }
   0x7   :  { %p527_p2 = pnand %p525_p1, %p522_p0 }
   0x9   :  { %530 = shalt.err (!%p527_p2)
}
   0xa   :  { %s531_s12 = scalar_lea.vmem %s33_s25, 2048  ;;  %p536_p4 = scmp.lt.s32.totalorder %s33_s25, %s33_s25 }
   0xb   :  { %p532_p3 = scmp.ne.s32.totalorder %s33_s25, %s531_s12  ;;  %p537_p5 = scmp.lt.s32.totalorder %s531_s12, %s531_s12 }
   0xd   :  { %p538_p6 = por %p537_p5, %p536_p4 }
   0xf   :  { %p539_p7 = pnand %p538_p6, %p532_p3 }
  0x11   :  { %542 = shalt.err (!%p539_p7)
}
  0x12   :  { %s617_s13 = smov 128   ;;  %s618_s14 = smov 8  }
  0x13   :  { %38 = dma.hbm_to_vmem [thread:$0]  %s745_s1, 2048, %s33_s25, [#allocation6], %s617_s13, %s617_s13, %s618_s14  }
  0x14   :  { %s543_s19 = scalar_lea.hbm %s744_s0, 256 }
  0x15   :  { %p544_p8 = scmp.ne.s32.totalorder %s744_s0, %s543_s19  ;;  %p547_p9 = scmp.lt.u32.totalorder %s543_s19, %s744_s0 }
  0x17   :  { %p549_p10 = pnand %p547_p9, %p544_p8 }
  0x19   :  { %552 = shalt.err (!%p549_p10)
}
  0x1a   :  { %s553_s24 = scalar_lea.vmem %s661_s27, 256  ;;  %p558_p12 = scmp.lt.s32.totalorder %s661_s27, %s661_s27 }
  0x1b   :  { %p554_p11 = scmp.ne.s32.totalorder %s661_s27, %s553_s24  ;;  %p559_p13 = scmp.lt.s32.totalorder %s553_s24, %s553_s24 }
  0x1d   :  { %p560_p0 = por %p559_p13, %p558_p12 }
  0x1f   :  { %p561_p1 = pnand %p560_p0, %p554_p11 }
  0x21   :  { %564 = shalt.err (!%p561_p1)
}
  0x22   :  { %26 = dma.hbm_to_vmem [thread:$0]  %s744_s0, 256, %s661_s27, [#allocation3], %s617_s13, %s617_s13, %s618_s14  }
  0x23   :  { %s619_s26 = smov [#allocation7]   ;;  %s565_s8 = scalar_lea.hbm %s747_s3, 2048 }
  0x24   :  { %s46_s28 = sshll.u32 %s619_s26, 4  ;;  %p566_p2 = scmp.ne.s32.totalorder %s747_s3, %s565_s8  ;;  %s47_s28 = int_to_ptr.vmem [resolvable:$true] %s46_s28 }
  0x25   :  { %p569_p3 = scmp.lt.u32.totalorder %s565_s8, %s747_s3 }
  0x27   :  { %p571_p4 = pnand %p569_p3, %p566_p2 }
  0x29   :  { %574 = shalt.err (!%p571_p4)
}
  0x2a   :  { %s575_s15 = scalar_lea.vmem %s47_s28, 2048  ;;  %p580_p6 = scmp.lt.s32.totalorder %s47_s28, %s47_s28 }
  0x2b   :  { %p576_p5 = scmp.ne.s32.totalorder %s47_s28, %s575_s15  ;;  %p581_p7 = scmp.lt.s32.totalorder %s575_s15, %s575_s15 }
  0x2d   :  { %p582_p8 = por %p581_p7, %p580_p6 }
  0x2f   :  { %p583_p9 = pnand %p582_p8, %p576_p5 }
  0x31   :  { %586 = shalt.err (!%p583_p9)
}
  0x32   :  { %52 = dma.hbm_to_vmem [thread:$0]  %s747_s3, 2048, %s47_s28, [#allocation6], %s617_s13, %s617_s13, %s618_s14  }
  0x33   :  { %609 = dma.done.wait [#allocation3], 256  }
  0x34   :  { %610 = vsyncadd [#allocation3], 4294967040 }
  0x35   :  { %611 = dma.done.wait [#allocation6], 4096  }
  0x36   :  { %612 = vsyncadd [#allocation6], 4294963200  ;;  %v70_v0 = vld [vmem:[#allocation5] sm:$0xff]  ;;  %v71_v1 = vld [vmem:[#allocation5 + $0x8] sm:$0xff]  ;;  %s620_s21 = smov [#allocation8]  }
  0x37   :  { %v72_v2 = vld [vmem:[#allocation5 + $0x10] sm:$0xff]  ;;  %v447_v3 = vpack.c.bf16 %v71_v1, %v70_v0  ;;  %v73_v4 = vld [vmem:[#allocation5 + $0x18] sm:$0xff]  ;;  %v74_v6 = vld [vmem:[#allocation5 + $0x20] sm:$0xff]  ;;  %v276_v0 = vlaneseq  ;;  %s324_s22 = sshll.u32 %s620_s21, 4  ;;  %s325_s22 = int_to_ptr.vmem [resolvable:$true] %s324_s22 }
  0x38   :  { %v451_v5 = vpack.c.bf16 %v73_v4, %v72_v2  ;;  %v75_v7 = vld [vmem:[#allocation5 + $0x28] sm:$0xff]  ;;  %v713_v8 = vld [vmem:[#allocation2] sm:$0xff]  ;;  %v170_v9 = vld [vmem:[#allocation7] sm:$0xff]  ;;  %s587_s23 = scalar_lea.vmem %s325_s22, 256  ;;  %p592_p11 = scmp.lt.s32.totalorder %s325_s22, %s325_s22 }
  0x39   :  { %448 = vmatprep.subr.bf16.mxu0 %v447_v3  ;;  %409 = vmatprep.mubr.f32.mxu0 %v713_v8  ;;  %v171_v10 = vld [vmem:[#allocation7 + $0x8] sm:$0xff]  ;;  %v172_v11 = vld [vmem:[#allocation7 + $0x10] sm:$0xff]  ;;  %v173_v13 = vld [vmem:[#allocation7 + $0x18] sm:$0xff]  ;;  %v455_v15 = vpack.c.bf16 %v75_v7, %v74_v6  ;;  %v277_v1 = vand.u32 127, %v276_v0  ;;  %p588_p10 = scmp.ne.s32.totalorder %s325_s22, %s587_s23  ;;  %p593_p12 = scmp.lt.s32.totalorder %s587_s23, %s587_s23 }
  0x3a   :  { %450 = vmatpush3.bf16.xpose.msra.mxu0 %v447_v3  ;;  %v479_v12 = vpack.c.bf16 %v171_v10, %v170_v9  ;;  %v483_v14 = vpack.c.bf16 %v173_v13, %v172_v11  ;;  %v174_v16 = vld [vmem:[#allocation7 + $0x20] sm:$0xff]  ;;  %v175_v17 = vld [vmem:[#allocation7 + $0x28] sm:$0xff]  ;;  %v76_v18 = vld [vmem:[#allocation5 + $0x30] sm:$0xff] }
  0x3b   :  { %452 = vmatprep.subr.bf16.mxu0 %v451_v5  ;;  %v77_v19 = vld [vmem:[#allocation5 + $0x38] sm:$0xff]  ;;  %v487_v20 = vpack.c.bf16 %v175_v17, %v174_v16  ;;  %v176_v22 = vld [vmem:[#allocation7 + $0x30] sm:$0xff]  ;;  %v78_v24 = vld [vmem:[#allocation5 + $0x40] sm:$0xff]  ;;  %vm278_vm0 = vcmp.lt.s32.totalorder %v277_v1, 32  ;;  %p594_p13 = por %p593_p12, %p592_p11 }
  0x3c   :  { %480 = vmatprep.subr.bf16.mxu1 %v479_v12  ;;  %v459_v21 = vpack.c.bf16 %v77_v19, %v76_v18  ;;  %v177_v23 = vld [vmem:[#allocation7 + $0x38] sm:$0xff]  ;;  %v79_v25 = vld [vmem:[#allocation5 + $0x48] sm:$0xff]  ;;  %v178_v28 = vld [vmem:[#allocation7 + $0x40] sm:$0xff] }
  0x3d   :  { %482 = vmatpush3.bf16.xpose.msra.mxu1 %v479_v12  ;;  %v491_v26 = vpack.c.bf16 %v177_v23, %v176_v22  ;;  %v463_v27 = vpack.c.bf16 %v79_v25, %v78_v24  ;;  %v179_v29 = vld [vmem:[#allocation7 + $0x48] sm:$0xff]  ;;  %v80_v30 = vld [vmem:[#allocation5 + $0x50] sm:$0xff]  ;;  %v81_v31 = vld [vmem:[#allocation5 + $0x58] sm:$0xff]  ;;  %p595_p0 = pnand %p594_p13, %p588_p10 }
  0x3e   :  { %484 = vmatprep.subr.bf16.mxu1 %v483_v14  ;;  %v495_v32 = vpack.c.bf16 %v179_v29, %v178_v28  ;;  %v467_v33 = vpack.c.bf16 %v81_v31, %v80_v30  ;;  %v180_v34 = vld [vmem:[#allocation7 + $0x50] sm:$0xff]  ;;  %v181_v35 = vld [vmem:[#allocation7 + $0x58] sm:$0xff]  ;;  %v82_v36 = vld [vmem:[#allocation5 + $0x60] sm:$0xff] }
  0x3f   :  { %v83_v37 = vld [vmem:[#allocation5 + $0x68] sm:$0xff]  ;;  %v499_v38 = vpack.c.bf16 %v181_v35, %v180_v34  ;;  %v182_v40 = vld [vmem:[#allocation7 + $0x60] sm:$0xff]  ;;  %v84_v42 = vld [vmem:[#allocation5 + $0x70] sm:$0xff] }
  0x40   :  { %v471_v39 = vpack.c.bf16 %v83_v37, %v82_v36  ;;  %v183_v41 = vld [vmem:[#allocation7 + $0x68] sm:$0xff]  ;;  %v85_v43 = vld [vmem:[#allocation5 + $0x78] sm:$0xff]  ;;  %v184_v46 = vld [vmem:[#allocation7 + $0x70] sm:$0xff] }
  0x41   :  { %v503_v44 = vpack.c.bf16 %v183_v41, %v182_v40  ;;  %v475_v45 = vpack.c.bf16 %v85_v43, %v84_v42  ;;  %v185_v47 = vld [vmem:[#allocation7 + $0x78] sm:$0xff]  ;;  %v337_v50 = vld [vmem:[%s746_s2] ss:$0 sm:$0xff] }
  0x42   :  { %454 = vmatpush3.bf16.xpose.msra.mxu0 %v451_v5  ;;  %v507_v48 = vpack.c.bf16 %v185_v47, %v184_v46  ;;  %v69_v49 = vld [vmem:[#allocation2 + $0x8] sm:$0xff]  ;;  %v338_v57 = vld [vmem:[%s748_s4] ss:$0 sm:$0xff] }
  0x43   :  { %456 = vmatprep.subr.bf16.mxu0 %v455_v15  ;;  %v339_v19 = vld [vmem:[%s749_s5] ss:$0 sm:$0xff] }
  0x45   :  { %486 = vmatpush3.bf16.xpose.msra.mxu1 %v483_v14 }
  0x46   :  { %488 = vmatprep.subr.bf16.mxu1 %v487_v20 }
  0x4a   :  { %458 = vmatpush3.bf16.xpose.msra.mxu0 %v455_v15 }
  0x4b   :  { %460 = vmatprep.subr.bf16.mxu0 %v459_v21 }
  0x4d   :  { %490 = vmatpush3.bf16.xpose.msra.mxu1 %v487_v20 }
  0x4e   :  { %492 = vmatprep.subr.bf16.mxu1 %v491_v26 }
  0x52   :  { %462 = vmatpush3.bf16.xpose.msra.mxu0 %v459_v21  ;;  %v340_v21 = vld [vmem:[%s750_s6] ss:$0 sm:$0xff] }
  0x53   :  { %464 = vmatprep.subr.bf16.mxu0 %v463_v27 }
  0x55   :  { %494 = vmatpush3.bf16.xpose.msra.mxu1 %v491_v26 }
  0x56   :  { %496 = vmatprep.subr.bf16.mxu1 %v495_v32 }
  0x5a   :  { %466 = vmatpush3.bf16.xpose.msra.mxu0 %v463_v27 }
  0x5b   :  { %468 = vmatprep.subr.bf16.mxu0 %v467_v33 }
  0x5d   :  { %498 = vmatpush3.bf16.xpose.msra.mxu1 %v495_v32 }
  0x5e   :  { %500 = vmatprep.subr.bf16.mxu1 %v499_v38 }
  0x62   :  { %470 = vmatpush3.bf16.xpose.msra.mxu0 %v467_v33 }
  0x63   :  { %472 = vmatprep.subr.bf16.mxu0 %v471_v39 }
  0x65   :  { %502 = vmatpush3.bf16.xpose.msra.mxu1 %v499_v38 }
  0x66   :  { %504 = vmatprep.subr.bf16.mxu1 %v503_v44 }
  0x6a   :  { %474 = vmatpush3.bf16.xpose.msra.mxu0 %v471_v39 }
  0x6b   :  { %476 = vmatprep.subr.bf16.mxu0 %v475_v45 }
  0x6d   :  { %506 = vmatpush3.bf16.xpose.msra.mxu1 %v503_v44 }
  0x6e   :  { %508 = vmatprep.subr.bf16.mxu1 %v507_v48 }
  0x72   :  { %478 = vmatpush3.bf16.xpose.msra.mxu0 %v475_v45 }
  0x75   :  { %510 = vmatpush3.bf16.xpose.msra.mxu1 %v507_v48 }
  0x79   :  { %410 = vmatmul.mubr.f32.vlgmr.msra.gmra.mrb[0].mxu0 %v69_v49 }
 0x14c   :  { %v411_v51 = vpop.f32.mrb[0].mxu0 }
 0x14d   :  { %v165_v52 = vadd.f32 %v411_v51, %v337_v50  ;;  %v159_v53 = vpop.f32.mrb[1].mxu0 }
 0x14e   :  { %v160_v54 = vadd.f32 %v337_v50, %v159_v53 }
 0x14f   :  { %v169_v56 = vmax.f32 %v165_v52, 0.0 }
 0x150   :  { %v168_v55 = vmax.f32 %v160_v54, 0.0 }
 0x152   :  { %444 = vmatprep.mubr.f32.mxu1 %v168_v55 }
 0x153   :  { %445 = vmatmul.mubr.f32.vlgmr.msra.gmra.mrb[0].mxu1 %v169_v56 }
 0x226   :  { %v446_v58 = vpop.f32.mrb[0].mxu1 }
 0x227   :  { %v259_v59 = vpop.f32.mrb[1].mxu1  ;;  %v265_v61 = vadd.f32 %v446_v58, %v338_v57 }
 0x228   :  { %v260_v60 = vadd.f32 %v338_v57, %v259_v59 }
 0x229   :  { %v269_v63 = vadd.f32 %v265_v61, %v69_v49 }
 0x22a   :  { %v268_v62 = vadd.f32 %v260_v60, %v713_v8 }
 0x22c   :  { %270 = vadd.xlane.f32.xlu0 %v268_v62 }
 0x230   :  { %272 = vadd.xlane.f32.xlu0 %v269_v63 }
 0x2b9   :  { %v271_v2 = vpop.xlane.xlu0 %270 }
 0x2ba   :  { %v274_v3 = vmul.f32 0.03125, %v271_v2 }
 0x2bc   :  { %v279_v4 = vsub.f32 %v268_v62, %v274_v3 }
 0x2bd   :  { %v273_v5 = vpop.xlane.xlu0 %272 }
 0x2be   :  { %v275_v6 = vmul.f32 0.03125, %v273_v5  ;;  %v283_v7 = vsel %vm278_vm0, %v279_v4, 0.0 }
 0x2bf   :  { %v285_v9 = vmul.f32 %v283_v7, %v283_v7 }
 0x2c0   :  { %v280_v10 = vsub.f32 %v269_v63, %v275_v6 }
 0x2c1   :  { %287 = vadd.xlane.f32.xlu1 %v285_v9 }
 0x2c2   :  { %v284_v11 = vsel %vm278_vm0, %v280_v10, 0.0 }
 0x2c3   :  { %v286_v12 = vmul.f32 %v284_v11, %v284_v11 }
 0x2c5   :  { %289 = vadd.xlane.f32.xlu1 %v286_v12 }
 0x34e   :  { %v288_v13 = vpop.xlane.xlu1 %287 }
 0x34f   :  { %v291_v8 = vmul.f32 0.03125, %v288_v13 }
 0x351   :  { %v293_v14 = vadd.f32 1e-05, %v291_v8 }
 0x352   :  { %v290_v15 = vpop.xlane.xlu1 %289 }
 0x353   :  { %517 = vrsqrt.f32 %v293_v14  ;;  %v292_v16 = vmul.f32 0.03125, %v290_v15 }
 0x355   :  { %v294_v17 = vadd.f32 1e-05, %v292_v16 }
 0x357   :  { %519 = vrsqrt.f32 %v294_v17 }
 0x35d   :  { %v518_v18 = vpop.eup %517 }
 0x35e   :  { %v297_v20 = vmul.f32 %v518_v18, %v283_v7 }
 0x360   :  { %v306_v22 = vmul.f32 %v339_v19, %v297_v20 }
 0x361   :  { %v520_v23 = vpop.eup %519 }
 0x362   :  { %v298_v24 = vmul.f32 %v520_v23, %v284_v11  ;;  %v315_v25 = vadd.f32 %v340_v21, %v306_v22 }
 0x364   :  { %v307_v26 = vmul.f32 %v339_v19, %v298_v24  ;;  %317 = vst [vmem:[#allocation8] sm:$0xff] %v315_v25 }
 0x366   :  { %v316_v27 = vadd.f32 %v340_v21, %v307_v26 }
 0x368   :  { %318 = vst [vmem:[#allocation8 + $0x8] sm:$0xff] %v316_v27 }
 0x369   :  { %598 = shalt.err (!%p595_p0)
}
 0x36a   :  { %s599_s24 = scalar_lea.hbm %s751_s7, 256 }
 0x36b   :  { %p600_p1 = scmp.ne.s32.totalorder %s751_s7, %s599_s24  ;;  %p603_p2 = scmp.lt.u32.totalorder %s599_s24, %s751_s7 }
 0x36d   :  { %p605_p3 = pnand %p603_p2, %p600_p1 }
 0x36f   :  { %608 = shalt.err (!%p605_p3)
}
 0x370   :  { %330 = dma.vmem_to_hbm [thread:$0]  %s325_s22, 256, %s751_s7, [#allocation4], %s617_s13, %s617_s13, %s618_s14  }
 0x371   :  { %613 = dma.done.wait [#allocation4], 256  }
 0x372   :  { %614 = vsyncadd [#allocation4], 4294967040 }
 0x373   :  { %334 = vsyncpa [#allocation3], 1 }
 0x374   :  { %335 = vsyncpa [#allocation6], 1 }
 0x375   :  { %336 = vsyncpa [#allocation4], 1 }

</bundles_post_ra>
